<compile_context>
chip_gen: v7x
topology: tpu7x:2x2x1
jax: 0.10.0
libtpu: 0.0.40
codegen_flags: <defaults>
</compile_context>

<pallas_src>
import jax
import jax.numpy as jnp
from jax.experimental import pallas as pl
from jax.experimental.pallas import tpu as pltpu


N_LAYERS = 12            # 2 x E, each E = 6 Linear(2,2) layers
RELU_AFTER = (3, 9)      # C.l1 inside each E
SIGMOID_AFTER = (5, 11)  # after D.b's second linear inside each E
F = 2                    # feature width of every Linear(2, 2)
PARAMS_PER_LAYER = 6     # w00, w01, w10, w11, b0, b1


def _mlp_chain_kernel(p_ref, x_ref, o_ref):
    # p_ref : SMEM f32[72]   flat params, 6 scalars per layer
    # x_ref : VMEM (2, Bp)   feature-major input, batch on lanes
    # o_ref : VMEM (2, Bp)   feature-major output
    y0 = x_ref[0:1, :].astype(jnp.float32)   # (1, Bp), lane-dense
    y1 = x_ref[1:2, :].astype(jnp.float32)   # (1, Bp), lane-dense

    for layer in range(N_LAYERS):            # static unroll (trace-time loop)
        base = layer * PARAMS_PER_LAYER
        w00 = p_ref[base + 0]
        w01 = p_ref[base + 1]
        w10 = p_ref[base + 2]
        w11 = p_ref[base + 3]
        b0 = p_ref[base + 4]
        b1 = p_ref[base + 5]

        # Linear(2,2) in feature-major form: y_new[j,:] = W[j,0]*y0 + W[j,1]*y1 + b[j]
        r0 = w00 * y0 + w01 * y1 + b0
        r1 = w10 * y0 + w11 * y1 + b1

        if layer in RELU_AFTER:
            r0 = jnp.maximum(r0, 0.0)
            r1 = jnp.maximum(r1, 0.0)
        if layer in SIGMOID_AFTER:
            r0 = jax.nn.sigmoid(r0)          # exp / recip on the EUP slot
            r1 = jax.nn.sigmoid(r1)

        y0, y1 = r0, r1

    o_ref[0:1, :] = y0.astype(o_ref.dtype)
    o_ref[1:2, :] = y1.astype(o_ref.dtype)


def main_with_module_list(x, weights, biases):
    """Forward of MainWithModuleList.

    x       : (B, 2) input
    weights : list of 12 arrays, each (2, 2) in PyTorch (F_out, F_in) layout
    biases  : list of 12 arrays, each (2,)
    """
    B, f_in = x.shape
    assert f_in == F and len(weights) == N_LAYERS and len(biases) == N_LAYERS

    # Flatten all params into one f32[72] SMEM slab:
    # per layer [W[0,0], W[0,1], W[1,0], W[1,1], b[0], b[1]].
    params = jnp.concatenate(
        [jnp.concatenate([w.reshape(-1), b.reshape(-1)])
         for w, b in zip(weights, biases)]
    ).astype(jnp.float32)                                   # (72,)

    # Feature-major, lane-dense: (B, 2) -> (2, Bp) with Bp a multiple of 128.
    bp = max(128, ((B + 127) // 128) * 128)
    x_t = jnp.zeros((F, bp), jnp.float32).at[:, :B].set(x.T.astype(jnp.float32))

    out_t = pl.pallas_call(
        _mlp_chain_kernel,
        out_shape=jax.ShapeDtypeStruct((F, bp), jnp.float32),
        in_specs=[
            pl.BlockSpec(memory_space=pltpu.MemorySpace.SMEM),   # params (scalars)
            pl.BlockSpec(memory_space=pltpu.MemorySpace.VMEM),   # x feature-major
        ],
        out_specs=pl.BlockSpec(memory_space=pltpu.MemorySpace.VMEM),
    )(params, x_t)

    return out_t[:, :B].T.astype(x.dtype)                   # back to (B, 2)


def _reference(x, weights, biases):
    """Plain-JAX reference with identical forward semantics."""
    y = x
    for layer in range(N_LAYERS):
        y = y @ weights[layer].T + biases[layer]
        if layer in RELU_AFTER:
            y = jnp.maximum(y, 0.0)
        if layer in SIGMOID_AFTER:
            y = jax.nn.sigmoid(y)
    return y


if __name__ == "__main__":
    key = jax.random.PRNGKey(0)
    B = 8  # small batch; feature width is fixed at 2 by the module

    keys = jax.random.split(key, 1 + 2 * N_LAYERS)
    x = jax.random.normal(keys[0], (B, F), jnp.float32)

    # Deterministic params mimicking nn.Linear's uniform(-1/sqrt(F_in), 1/sqrt(F_in))
    bound = 1.0 / float(jnp.sqrt(jnp.float32(F)))
    weights = [
        jax.random.uniform(keys[1 + 2 * l], (F, F), jnp.float32, -bound, bound)
        for l in range(N_LAYERS)
    ]
    biases = [
        jax.random.uniform(keys[2 + 2 * l], (F,), jnp.float32, -bound, bound)
        for l in range(N_LAYERS)
    ]

    y = main_with_module_list(x, weights, biases)
    y = jax.block_until_ready(y)

    y_ref = _reference(x, weights, biases)
    assert y.shape == (B, F)
    assert jnp.allclose(y, y_ref, atol=1e-5, rtol=1e-5), "mismatch vs reference"

    print("KERNEL_OK")
</pallas_src>

<mosaic_0001>
module attributes {stable_mosaic.version = 11 : i64} {
  func.func @_mlp_chain_kernel(%arg0: memref<72xf32, #tpu.memory_space<smem>>, %arg1: memref<2x128xf32, #tpu.memory_space<vmem>>, %arg2: memref<2x128xf32, #tpu.memory_space<vmem>>) attributes {dimension_semantics = [], scalar_prefetch = 0 : i64, scratch_operands = 0 : i64, tpu.core_type = #tpu.core_type<tc>} {
    %c0 = arith.constant 0 : index
    %c0_0 = arith.constant 0 : index
    %0 = vector.load %arg1[%c0, %c0_0] : memref<2x128xf32, #tpu.memory_space<vmem>>, vector<1x128xf32>
    %c1 = arith.constant 1 : index
    %c0_1 = arith.constant 0 : index
    %1 = vector.load %arg1[%c1, %c0_1] : memref<2x128xf32, #tpu.memory_space<vmem>>, vector<1x128xf32>
    %c0_2 = arith.constant 0 : index
    %2 = memref.load %arg0[%c0_2] : memref<72xf32, #tpu.memory_space<smem>>
    %c1_3 = arith.constant 1 : index
    %3 = memref.load %arg0[%c1_3] : memref<72xf32, #tpu.memory_space<smem>>
    %c2 = arith.constant 2 : index
    %4 = memref.load %arg0[%c2] : memref<72xf32, #tpu.memory_space<smem>>
    %c3 = arith.constant 3 : index
    %5 = memref.load %arg0[%c3] : memref<72xf32, #tpu.memory_space<smem>>
    %c4 = arith.constant 4 : index
    %6 = memref.load %arg0[%c4] : memref<72xf32, #tpu.memory_space<smem>>
    %c5 = arith.constant 5 : index
    %7 = memref.load %arg0[%c5] : memref<72xf32, #tpu.memory_space<smem>>
    %8 = vector.broadcast %2 : f32 to vector<1x128xf32>
    %9 = arith.mulf %8, %0 : vector<1x128xf32>
    %10 = vector.broadcast %3 : f32 to vector<1x128xf32>
    %11 = arith.mulf %10, %1 : vector<1x128xf32>
    %12 = arith.addf %9, %11 : vector<1x128xf32>
    %13 = vector.broadcast %6 : f32 to vector<1x128xf32>
    %14 = arith.addf %12, %13 : vector<1x128xf32>
    %15 = vector.broadcast %4 : f32 to vector<1x128xf32>
    %16 = arith.mulf %15, %0 : vector<1x128xf32>
    %17 = vector.broadcast %5 : f32 to vector<1x128xf32>
    %18 = arith.mulf %17, %1 : vector<1x128xf32>
    %19 = arith.addf %16, %18 : vector<1x128xf32>
    %20 = vector.broadcast %7 : f32 to vector<1x128xf32>
    %21 = arith.addf %19, %20 : vector<1x128xf32>
    %c6 = arith.constant 6 : index
    %22 = memref.load %arg0[%c6] : memref<72xf32, #tpu.memory_space<smem>>
    %c7 = arith.constant 7 : index
    %23 = memref.load %arg0[%c7] : memref<72xf32, #tpu.memory_space<smem>>
    %c8 = arith.constant 8 : index
    %24 = memref.load %arg0[%c8] : memref<72xf32, #tpu.memory_space<smem>>
    %c9 = arith.constant 9 : index
    %25 = memref.load %arg0[%c9] : memref<72xf32, #tpu.memory_space<smem>>
    %c10 = arith.constant 10 : index
    %26 = memref.load %arg0[%c10] : memref<72xf32, #tpu.memory_space<smem>>
    %c11 = arith.constant 11 : index
    %27 = memref.load %arg0[%c11] : memref<72xf32, #tpu.memory_space<smem>>
    %28 = vector.broadcast %22 : f32 to vector<1x128xf32>
    %29 = arith.mulf %28, %14 : vector<1x128xf32>
    %30 = vector.broadcast %23 : f32 to vector<1x128xf32>
    %31 = arith.mulf %30, %21 : vector<1x128xf32>
    %32 = arith.addf %29, %31 : vector<1x128xf32>
    %33 = vector.broadcast %26 : f32 to vector<1x128xf32>
    %34 = arith.addf %32, %33 : vector<1x128xf32>
    %35 = vector.broadcast %24 : f32 to vector<1x128xf32>
    %36 = arith.mulf %35, %14 : vector<1x128xf32>
    %37 = vector.broadcast %25 : f32 to vector<1x128xf32>
    %38 = arith.mulf %37, %21 : vector<1x128xf32>
    %39 = arith.addf %36, %38 : vector<1x128xf32>
    %40 = vector.broadcast %27 : f32 to vector<1x128xf32>
    %41 = arith.addf %39, %40 : vector<1x128xf32>
    %c12 = arith.constant 12 : index
    %42 = memref.load %arg0[%c12] : memref<72xf32, #tpu.memory_space<smem>>
    %c13 = arith.constant 13 : index
    %43 = memref.load %arg0[%c13] : memref<72xf32, #tpu.memory_space<smem>>
    %c14 = arith.constant 14 : index
    %44 = memref.load %arg0[%c14] : memref<72xf32, #tpu.memory_space<smem>>
    %c15 = arith.constant 15 : index
    %45 = memref.load %arg0[%c15] : memref<72xf32, #tpu.memory_space<smem>>
    %c16 = arith.constant 16 : index
    %46 = memref.load %arg0[%c16] : memref<72xf32, #tpu.memory_space<smem>>
    %c17 = arith.constant 17 : index
    %47 = memref.load %arg0[%c17] : memref<72xf32, #tpu.memory_space<smem>>
    %48 = vector.broadcast %42 : f32 to vector<1x128xf32>
    %49 = arith.mulf %48, %34 : vector<1x128xf32>
    %50 = vector.broadcast %43 : f32 to vector<1x128xf32>
    %51 = arith.mulf %50, %41 : vector<1x128xf32>
    %52 = arith.addf %49, %51 : vector<1x128xf32>
    %53 = vector.broadcast %46 : f32 to vector<1x128xf32>
    %54 = arith.addf %52, %53 : vector<1x128xf32>
    %55 = vector.broadcast %44 : f32 to vector<1x128xf32>
    %56 = arith.mulf %55, %34 : vector<1x128xf32>
    %57 = vector.broadcast %45 : f32 to vector<1x128xf32>
    %58 = arith.mulf %57, %41 : vector<1x128xf32>
    %59 = arith.addf %56, %58 : vector<1x128xf32>
    %60 = vector.broadcast %47 : f32 to vector<1x128xf32>
    %61 = arith.addf %59, %60 : vector<1x128xf32>
    %c18 = arith.constant 18 : index
    %62 = memref.load %arg0[%c18] : memref<72xf32, #tpu.memory_space<smem>>
    %c19 = arith.constant 19 : index
    %63 = memref.load %arg0[%c19] : memref<72xf32, #tpu.memory_space<smem>>
    %c20 = arith.constant 20 : index
    %64 = memref.load %arg0[%c20] : memref<72xf32, #tpu.memory_space<smem>>
    %c21 = arith.constant 21 : index
    %65 = memref.load %arg0[%c21] : memref<72xf32, #tpu.memory_space<smem>>
    %c22 = arith.constant 22 : index
    %66 = memref.load %arg0[%c22] : memref<72xf32, #tpu.memory_space<smem>>
    %c23 = arith.constant 23 : index
    %67 = memref.load %arg0[%c23] : memref<72xf32, #tpu.memory_space<smem>>
    %68 = vector.broadcast %62 : f32 to vector<1x128xf32>
    %69 = arith.mulf %68, %54 : vector<1x128xf32>
    %70 = vector.broadcast %63 : f32 to vector<1x128xf32>
    %71 = arith.mulf %70, %61 : vector<1x128xf32>
    %72 = arith.addf %69, %71 : vector<1x128xf32>
    %73 = vector.broadcast %66 : f32 to vector<1x128xf32>
    %74 = arith.addf %72, %73 : vector<1x128xf32>
    %75 = vector.broadcast %64 : f32 to vector<1x128xf32>
    %76 = arith.mulf %75, %54 : vector<1x128xf32>
    %77 = vector.broadcast %65 : f32 to vector<1x128xf32>
    %78 = arith.mulf %77, %61 : vector<1x128xf32>
    %79 = arith.addf %76, %78 : vector<1x128xf32>
    %80 = vector.broadcast %67 : f32 to vector<1x128xf32>
    %81 = arith.addf %79, %80 : vector<1x128xf32>
    %cst = arith.constant 0.000000e+00 : f32
    %82 = vector.broadcast %cst : f32 to vector<1x128xf32>
    %83 = arith.maximumf %74, %82 : vector<1x128xf32>
    %cst_4 = arith.constant 0.000000e+00 : f32
    %84 = vector.broadcast %cst_4 : f32 to vector<1x128xf32>
    %85 = arith.maximumf %81, %84 : vector<1x128xf32>
    %c24 = arith.constant 24 : index
    %86 = memref.load %arg0[%c24] : memref<72xf32, #tpu.memory_space<smem>>
    %c25 = arith.constant 25 : index
    %87 = memref.load %arg0[%c25] : memref<72xf32, #tpu.memory_space<smem>>
    %c26 = arith.constant 26 : index
    %88 = memref.load %arg0[%c26] : memref<72xf32, #tpu.memory_space<smem>>
    %c27 = arith.constant 27 : index
    %89 = memref.load %arg0[%c27] : memref<72xf32, #tpu.memory_space<smem>>
    %c28 = arith.constant 28 : index
    %90 = memref.load %arg0[%c28] : memref<72xf32, #tpu.memory_space<smem>>
    %c29 = arith.constant 29 : index
    %91 = memref.load %arg0[%c29] : memref<72xf32, #tpu.memory_space<smem>>
    %92 = vector.broadcast %86 : f32 to vector<1x128xf32>
    %93 = arith.mulf %92, %83 : vector<1x128xf32>
    %94 = vector.broadcast %87 : f32 to vector<1x128xf32>
    %95 = arith.mulf %94, %85 : vector<1x128xf32>
    %96 = arith.addf %93, %95 : vector<1x128xf32>
    %97 = vector.broadcast %90 : f32 to vector<1x128xf32>
    %98 = arith.addf %96, %97 : vector<1x128xf32>
    %99 = vector.broadcast %88 : f32 to vector<1x128xf32>
    %100 = arith.mulf %99, %83 : vector<1x128xf32>
    %101 = vector.broadcast %89 : f32 to vector<1x128xf32>
    %102 = arith.mulf %101, %85 : vector<1x128xf32>
    %103 = arith.addf %100, %102 : vector<1x128xf32>
    %104 = vector.broadcast %91 : f32 to vector<1x128xf32>
    %105 = arith.addf %103, %104 : vector<1x128xf32>
    %c30 = arith.constant 30 : index
    %106 = memref.load %arg0[%c30] : memref<72xf32, #tpu.memory_space<smem>>
    %c31 = arith.constant 31 : index
    %107 = memref.load %arg0[%c31] : memref<72xf32, #tpu.memory_space<smem>>
    %c32 = arith.constant 32 : index
    %108 = memref.load %arg0[%c32] : memref<72xf32, #tpu.memory_space<smem>>
    %c33 = arith.constant 33 : index
    %109 = memref.load %arg0[%c33] : memref<72xf32, #tpu.memory_space<smem>>
    %c34 = arith.constant 34 : index
    %110 = memref.load %arg0[%c34] : memref<72xf32, #tpu.memory_space<smem>>
    %c35 = arith.constant 35 : index
    %111 = memref.load %arg0[%c35] : memref<72xf32, #tpu.memory_space<smem>>
    %112 = vector.broadcast %106 : f32 to vector<1x128xf32>
    %113 = arith.mulf %112, %98 : vector<1x128xf32>
    %114 = vector.broadcast %107 : f32 to vector<1x128xf32>
    %115 = arith.mulf %114, %105 : vector<1x128xf32>
    %116 = arith.addf %113, %115 : vector<1x128xf32>
    %117 = vector.broadcast %110 : f32 to vector<1x128xf32>
    %118 = arith.addf %116, %117 : vector<1x128xf32>
    %119 = vector.broadcast %108 : f32 to vector<1x128xf32>
    %120 = arith.mulf %119, %98 : vector<1x128xf32>
    %121 = vector.broadcast %109 : f32 to vector<1x128xf32>
    %122 = arith.mulf %121, %105 : vector<1x128xf32>
    %123 = arith.addf %120, %122 : vector<1x128xf32>
    %124 = vector.broadcast %111 : f32 to vector<1x128xf32>
    %125 = arith.addf %123, %124 : vector<1x128xf32>
    %126 = arith.negf %118 : vector<1x128xf32>
    %127 = math.exp %126 : vector<1x128xf32>
    %cst_5 = arith.constant 1.000000e+00 : f32
    %128 = vector.broadcast %cst_5 : f32 to vector<1x128xf32>
    %129 = arith.addf %128, %127 : vector<1x128xf32>
    %130 = arith.divf %128, %129 : vector<1x128xf32>
    %131 = arith.negf %125 : vector<1x128xf32>
    %132 = math.exp %131 : vector<1x128xf32>
    %cst_6 = arith.constant 1.000000e+00 : f32
    %133 = vector.broadcast %cst_6 : f32 to vector<1x128xf32>
    %134 = arith.addf %133, %132 : vector<1x128xf32>
    %135 = arith.divf %133, %134 : vector<1x128xf32>
    %c36 = arith.constant 36 : index
    %136 = memref.load %arg0[%c36] : memref<72xf32, #tpu.memory_space<smem>>
    %c37 = arith.constant 37 : index
    %137 = memref.load %arg0[%c37] : memref<72xf32, #tpu.memory_space<smem>>
    %c38 = arith.constant 38 : index
    %138 = memref.load %arg0[%c38] : memref<72xf32, #tpu.memory_space<smem>>
    %c39 = arith.constant 39 : index
    %139 = memref.load %arg0[%c39] : memref<72xf32, #tpu.memory_space<smem>>
    %c40 = arith.constant 40 : index
    %140 = memref.load %arg0[%c40] : memref<72xf32, #tpu.memory_space<smem>>
    %c41 = arith.constant 41 : index
    %141 = memref.load %arg0[%c41] : memref<72xf32, #tpu.memory_space<smem>>
    %142 = vector.broadcast %136 : f32 to vector<1x128xf32>
    %143 = arith.mulf %142, %130 : vector<1x128xf32>
    %144 = vector.broadcast %137 : f32 to vector<1x128xf32>
    %145 = arith.mulf %144, %135 : vector<1x128xf32>
    %146 = arith.addf %143, %145 : vector<1x128xf32>
    %147 = vector.broadcast %140 : f32 to vector<1x128xf32>
    %148 = arith.addf %146, %147 : vector<1x128xf32>
    %149 = vector.broadcast %138 : f32 to vector<1x128xf32>
    %150 = arith.mulf %149, %130 : vector<1x128xf32>
    %151 = vector.broadcast %139 : f32 to vector<1x128xf32>
    %152 = arith.mulf %151, %135 : vector<1x128xf32>
    %153 = arith.addf %150, %152 : vector<1x128xf32>
    %154 = vector.broadcast %141 : f32 to vector<1x128xf32>
    %155 = arith.addf %153, %154 : vector<1x128xf32>
    %c42 = arith.constant 42 : index
    %156 = memref.load %arg0[%c42] : memref<72xf32, #tpu.memory_space<smem>>
    %c43 = arith.constant 43 : index
    %157 = memref.load %arg0[%c43] : memref<72xf32, #tpu.memory_space<smem>>
    %c44 = arith.constant 44 : index
    %158 = memref.load %arg0[%c44] : memref<72xf32, #tpu.memory_space<smem>>
    %c45 = arith.constant 45 : index
    %159 = memref.load %arg0[%c45] : memref<72xf32, #tpu.memory_space<smem>>
    %c46 = arith.constant 46 : index
    %160 = memref.load %arg0[%c46] : memref<72xf32, #tpu.memory_space<smem>>
    %c47 = arith.constant 47 : index
    %161 = memref.load %arg0[%c47] : memref<72xf32, #tpu.memory_space<smem>>
    %162 = vector.broadcast %156 : f32 to vector<1x128xf32>
    %163 = arith.mulf %162, %148 : vector<1x128xf32>
    %164 = vector.broadcast %157 : f32 to vector<1x128xf32>
    %165 = arith.mulf %164, %155 : vector<1x128xf32>
    %166 = arith.addf %163, %165 : vector<1x128xf32>
    %167 = vector.broadcast %160 : f32 to vector<1x128xf32>
    %168 = arith.addf %166, %167 : vector<1x128xf32>
    %169 = vector.broadcast %158 : f32 to vector<1x128xf32>
    %170 = arith.mulf %169, %148 : vector<1x128xf32>
    %171 = vector.broadcast %159 : f32 to vector<1x128xf32>
    %172 = arith.mulf %171, %155 : vector<1x128xf32>
    %173 = arith.addf %170, %172 : vector<1x128xf32>
    %174 = vector.broadcast %161 : f32 to vector<1x128xf32>
    %175 = arith.addf %173, %174 : vector<1x128xf32>
    %c48 = arith.constant 48 : index
    %176 = memref.load %arg0[%c48] : memref<72xf32, #tpu.memory_space<smem>>
    %c49 = arith.constant 49 : index
    %177 = memref.load %arg0[%c49] : memref<72xf32, #tpu.memory_space<smem>>
    %c50 = arith.constant 50 : index
    %178 = memref.load %arg0[%c50] : memref<72xf32, #tpu.memory_space<smem>>
    %c51 = arith.constant 51 : index
    %179 = memref.load %arg0[%c51] : memref<72xf32, #tpu.memory_space<smem>>
    %c52 = arith.constant 52 : index
    %180 = memref.load %arg0[%c52] : memref<72xf32, #tpu.memory_space<smem>>
    %c53 = arith.constant 53 : index
    %181 = memref.load %arg0[%c53] : memref<72xf32, #tpu.memory_space<smem>>
    %182 = vector.broadcast %176 : f32 to vector<1x128xf32>
    %183 = arith.mulf %182, %168 : vector<1x128xf32>
    %184 = vector.broadcast %177 : f32 to vector<1x128xf32>
    %185 = arith.mulf %184, %175 : vector<1x128xf32>
    %186 = arith.addf %183, %185 : vector<1x128xf32>
    %187 = vector.broadcast %180 : f32 to vector<1x128xf32>
    %188 = arith.addf %186, %187 : vector<1x128xf32>
    %189 = vector.broadcast %178 : f32 to vector<1x128xf32>
    %190 = arith.mulf %189, %168 : vector<1x128xf32>
    %191 = vector.broadcast %179 : f32 to vector<1x128xf32>
    %192 = arith.mulf %191, %175 : vector<1x128xf32>
    %193 = arith.addf %190, %192 : vector<1x128xf32>
    %194 = vector.broadcast %181 : f32 to vector<1x128xf32>
    %195 = arith.addf %193, %194 : vector<1x128xf32>
    %c54 = arith.constant 54 : index
    %196 = memref.load %arg0[%c54] : memref<72xf32, #tpu.memory_space<smem>>
    %c55 = arith.constant 55 : index
    %197 = memref.load %arg0[%c55] : memref<72xf32, #tpu.memory_space<smem>>
    %c56 = arith.constant 56 : index
    %198 = memref.load %arg0[%c56] : memref<72xf32, #tpu.memory_space<smem>>
    %c57 = arith.constant 57 : index
    %199 = memref.load %arg0[%c57] : memref<72xf32, #tpu.memory_space<smem>>
    %c58 = arith.constant 58 : index
    %200 = memref.load %arg0[%c58] : memref<72xf32, #tpu.memory_space<smem>>
    %c59 = arith.constant 59 : index
    %201 = memref.load %arg0[%c59] : memref<72xf32, #tpu.memory_space<smem>>
    %202 = vector.broadcast %196 : f32 to vector<1x128xf32>
    %203 = arith.mulf %202, %188 : vector<1x128xf32>
    %204 = vector.broadcast %197 : f32 to vector<1x128xf32>
    %205 = arith.mulf %204, %195 : vector<1x128xf32>
    %206 = arith.addf %203, %205 : vector<1x128xf32>
    %207 = vector.broadcast %200 : f32 to vector<1x128xf32>
    %208 = arith.addf %206, %207 : vector<1x128xf32>
    %209 = vector.broadcast %198 : f32 to vector<1x128xf32>
    %210 = arith.mulf %209, %188 : vector<1x128xf32>
    %211 = vector.broadcast %199 : f32 to vector<1x128xf32>
    %212 = arith.mulf %211, %195 : vector<1x128xf32>
    %213 = arith.addf %210, %212 : vector<1x128xf32>
    %214 = vector.broadcast %201 : f32 to vector<1x128xf32>
    %215 = arith.addf %213, %214 : vector<1x128xf32>
    %cst_7 = arith.constant 0.000000e+00 : f32
    %216 = vector.broadcast %cst_7 : f32 to vector<1x128xf32>
    %217 = arith.maximumf %208, %216 : vector<1x128xf32>
    %cst_8 = arith.constant 0.000000e+00 : f32
    %218 = vector.broadcast %cst_8 : f32 to vector<1x128xf32>
    %219 = arith.maximumf %215, %218 : vector<1x128xf32>
    %c60 = arith.constant 60 : index
    %220 = memref.load %arg0[%c60] : memref<72xf32, #tpu.memory_space<smem>>
    %c61 = arith.constant 61 : index
    %221 = memref.load %arg0[%c61] : memref<72xf32, #tpu.memory_space<smem>>
    %c62 = arith.constant 62 : index
    %222 = memref.load %arg0[%c62] : memref<72xf32, #tpu.memory_space<smem>>
    %c63 = arith.constant 63 : index
    %223 = memref.load %arg0[%c63] : memref<72xf32, #tpu.memory_space<smem>>
    %c64 = arith.constant 64 : index
    %224 = memref.load %arg0[%c64] : memref<72xf32, #tpu.memory_space<smem>>
    %c65 = arith.constant 65 : index
    %225 = memref.load %arg0[%c65] : memref<72xf32, #tpu.memory_space<smem>>
    %226 = vector.broadcast %220 : f32 to vector<1x128xf32>
    %227 = arith.mulf %226, %217 : vector<1x128xf32>
    %228 = vector.broadcast %221 : f32 to vector<1x128xf32>
    %229 = arith.mulf %228, %219 : vector<1x128xf32>
    %230 = arith.addf %227, %229 : vector<1x128xf32>
    %231 = vector.broadcast %224 : f32 to vector<1x128xf32>
    %232 = arith.addf %230, %231 : vector<1x128xf32>
    %233 = vector.broadcast %222 : f32 to vector<1x128xf32>
    %234 = arith.mulf %233, %217 : vector<1x128xf32>
    %235 = vector.broadcast %223 : f32 to vector<1x128xf32>
    %236 = arith.mulf %235, %219 : vector<1x128xf32>
    %237 = arith.addf %234, %236 : vector<1x128xf32>
    %238 = vector.broadcast %225 : f32 to vector<1x128xf32>
    %239 = arith.addf %237, %238 : vector<1x128xf32>
    %c66 = arith.constant 66 : index
    %240 = memref.load %arg0[%c66] : memref<72xf32, #tpu.memory_space<smem>>
    %c67 = arith.constant 67 : index
    %241 = memref.load %arg0[%c67] : memref<72xf32, #tpu.memory_space<smem>>
    %c68 = arith.constant 68 : index
    %242 = memref.load %arg0[%c68] : memref<72xf32, #tpu.memory_space<smem>>
    %c69 = arith.constant 69 : index
    %243 = memref.load %arg0[%c69] : memref<72xf32, #tpu.memory_space<smem>>
    %c70 = arith.constant 70 : index
    %244 = memref.load %arg0[%c70] : memref<72xf32, #tpu.memory_space<smem>>
    %c71 = arith.constant 71 : index
    %245 = memref.load %arg0[%c71] : memref<72xf32, #tpu.memory_space<smem>>
    %246 = vector.broadcast %240 : f32 to vector<1x128xf32>
    %247 = arith.mulf %246, %232 : vector<1x128xf32>
    %248 = vector.broadcast %241 : f32 to vector<1x128xf32>
    %249 = arith.mulf %248, %239 : vector<1x128xf32>
    %250 = arith.addf %247, %249 : vector<1x128xf32>
    %251 = vector.broadcast %244 : f32 to vector<1x128xf32>
    %252 = arith.addf %250, %251 : vector<1x128xf32>
    %253 = vector.broadcast %242 : f32 to vector<1x128xf32>
    %254 = arith.mulf %253, %232 : vector<1x128xf32>
    %255 = vector.broadcast %243 : f32 to vector<1x128xf32>
    %256 = arith.mulf %255, %239 : vector<1x128xf32>
    %257 = arith.addf %254, %256 : vector<1x128xf32>
    %258 = vector.broadcast %245 : f32 to vector<1x128xf32>
    %259 = arith.addf %257, %258 : vector<1x128xf32>
    %260 = arith.negf %252 : vector<1x128xf32>
    %261 = math.exp %260 : vector<1x128xf32>
    %cst_9 = arith.constant 1.000000e+00 : f32
    %262 = vector.broadcast %cst_9 : f32 to vector<1x128xf32>
    %263 = arith.addf %262, %261 : vector<1x128xf32>
    %264 = arith.divf %262, %263 : vector<1x128xf32>
    %265 = arith.negf %259 : vector<1x128xf32>
    %266 = math.exp %265 : vector<1x128xf32>
    %cst_10 = arith.constant 1.000000e+00 : f32
    %267 = vector.broadcast %cst_10 : f32 to vector<1x128xf32>
    %268 = arith.addf %267, %266 : vector<1x128xf32>
    %269 = arith.divf %267, %268 : vector<1x128xf32>
    %c0_11 = arith.constant 0 : index
    %c0_12 = arith.constant 0 : index
    %270 = vector.load %arg2[%c0_11, %c0_12] : memref<2x128xf32, #tpu.memory_space<vmem>>, vector<1x128xf32>
    tpu.vector_store %arg2[%c0_11, %c0_12], %264 {strides = array<i32>} : memref<2x128xf32, #tpu.memory_space<vmem>>, vector<1x128xf32>,
    %c1_13 = arith.constant 1 : index
    %c0_14 = arith.constant 0 : index
    %271 = vector.load %arg2[%c1_13, %c0_14] : memref<2x128xf32, #tpu.memory_space<vmem>>, vector<1x128xf32>
    tpu.vector_store %arg2[%c1_13, %c0_14], %269 {strides = array<i32>} : memref<2x128xf32, #tpu.memory_space<vmem>>, vector<1x128xf32>,
    return
  }
}

</mosaic_0001>

<bundles_post_ra>
// kernel: tpu_custom_call.1
= control target key start
LH: loop header
LB: loop body
LE: loop exit
PB: predicated region body
PF: predicated region fallthrough
CT: control target
= control target key end

     0   :  { %7 = vsyncpa [#allocation4], 0  ;;  %s609_s0 = inlined_call_operand.hbm [shape: f32[72], index: 0, kind: input, shape index: {}]   ;;  %s610_s1 = inlined_call_operand.vmem [shape: f32[2,128], index: 1, kind: input, shape index: {}]   ;;  %s611_s2 = inlined_call_operand.hbm [shape: f32[2,128], index: 2, kind: output, shape index: {}]  }
   0x1   :  { %8 = vsyncpa [#allocation3], 0  ;;  %s403_s11 = scalar_lea.hbm %s609_s0, 16 }
   0x2   :  { %p404_p0 = scmp.ne.s32.totalorder %s609_s0, %s403_s11  ;;  %p407_p1 = scmp.lt.u32.totalorder %s403_s11, %s609_s0 }
   0x4   :  { %p409_p2 = pnand %p407_p1, %p404_p0 }
   0x6   :  { %412 = shalt.err (!%p409_p2)
}
   0x7   :  { %s439_s16 = smov [#allocation2]  }
   0x8   :  { %16 = dma.hbm_to_smem %s609_s0, 16, %s439_s16, [#allocation4]  }
   0x9   :  { %435 = dma.done.wait [#allocation4], 16  }
   0xa   :  { %436 = vsyncadd [#allocation4], 4294967280 }
   0xb   :  { %22 = sfence }
   0xc   :  { %s25_s19 = sld [smem:[#allocation2]]  ;;  %s310_s20 = sld [smem:[#allocation2 + $0x1]]  ;;  %v23_v0 = vld [vmem:[%s610_s1] sm:$0x1]  ;;  %v24_v1 = vld [vmem:[%s610_s1 + $0x1] sm:$0x1] }
   0xd   :  { %s311_s21 = sld [smem:[#allocation2 + $0x2]]  ;;  %s312_s22 = sld [smem:[#allocation2 + $0x3]] }
   0xe   :  { %s313_s23 = sld [smem:[#allocation2 + $0x4]]  ;;  %s468_s24 = sld [smem:[#allocation2 + $0x5]] }
   0xf   :  { %s315_s25 = sld [smem:[#allocation2 + $0x6]]  ;;  %s473_s28 = sld [smem:[#allocation2 + $0x7]] }
  0x10   :  { %s317_s29 = sld [smem:[#allocation2 + $0x8]]  ;;  %s318_s3 = sld [smem:[#allocation2 + $0x9]] }
  0x11   :  { %s478_s4 = sld [smem:[#allocation2 + $0xa]]  ;;  %s480_s5 = sld [smem:[#allocation2 + $0xb]] }
  0x12   :  { %v31_v2 = vstv %s25_s19  ;;  %v33_v4 = vstv %s310_s20  ;;  %s482_s6 = sld [smem:[#allocation2 + $0xc]]  ;;  %s484_s7 = sld [smem:[#allocation2 + $0xd]] }
  0x13   :  { %v32_v3 = vmul.f32 %v31_v2, %v23_v0  ;;  %v38_v5 = vstv %s311_s21  ;;  %v34_v6 = vmul.f32 %v33_v4, %v24_v1  ;;  %v40_v8 = vstv %s312_s22  ;;  %s487_s1 = sld [smem:[#allocation2 + $0xe]]  ;;  %s489_s8 = sld [smem:[#allocation2 + $0xf]] }
  0x14   :  { %v39_v7 = vmul.f32 %v38_v5, %v23_v0  ;;  %v36_v9 = vstv %s313_s23  ;;  %v41_v10 = vmul.f32 %v40_v8, %v24_v1  ;;  %v43_v12 = vstv %s468_s24  ;;  %s492_s9 = sld [smem:[#allocation2 + $0x10]]  ;;  %s494_s10 = sld [smem:[#allocation2 + $0x11]] }
  0x15   :  { %v35_v11 = vadd.f32 %v34_v6, %v32_v3  ;;  %v51_v14 = vstv %s315_s25  ;;  %v53_v17 = vstv %s473_s28  ;;  %s496_s11 = sld [smem:[#allocation2 + $0x12]]  ;;  %s498_s12 = sld [smem:[#allocation2 + $0x13]] }
  0x16   :  { %v42_v13 = vadd.f32 %v41_v10, %v39_v7  ;;  %v58_v15 = vstv %s317_s29  ;;  %v60_v18 = vstv %s318_s3  ;;  %s502_s13 = sld [smem:[#allocation2 + $0x14]]  ;;  %s504_s14 = sld [smem:[#allocation2 + $0x15]] }
  0x17   :  { %v37_v16 = vadd.f32 %v36_v9, %v35_v11  ;;  %v56_v24 = vstv %s478_s4  ;;  %v63_v25 = vstv %s480_s5  ;;  %s510_s15 = sld [smem:[#allocation2 + $0x16]]  ;;  %s512_s16 = sld [smem:[#allocation2 + $0x17]] }
  0x18   :  { %v44_v19 = vadd.f32 %v43_v12, %v42_v13  ;;  %v71_v28 = vstv %s482_s6  ;;  %v73_v29 = vstv %s484_s7  ;;  %s516_s17 = sld [smem:[#allocation2 + $0x18]]  ;;  %s518_s18 = sld [smem:[#allocation2 + $0x19]] }
  0x19   :  { %v52_v20 = vmul.f32 %v51_v14, %v37_v16  ;;  %v59_v21 = vmul.f32 %v58_v15, %v37_v16  ;;  %v78_v30 = vstv %s487_s1  ;;  %v80_v31 = vstv %s489_s8  ;;  %s335_s19 = sld [smem:[#allocation2 + $0x1a]]  ;;  %s336_s20 = sld [smem:[#allocation2 + $0x1b]] }
  0x1a   :  { %v54_v22 = vmul.f32 %v53_v17, %v44_v19  ;;  %v61_v23 = vmul.f32 %v60_v18, %v44_v19  ;;  %v76_v38 = vstv %s492_s9  ;;  %v83_v39 = vstv %s494_s10  ;;  %s526_s21 = sld [smem:[#allocation2 + $0x1c]]  ;;  %s338_s22 = sld [smem:[#allocation2 + $0x1d]] }
  0x1b   :  { %v91_v42 = vstv %s496_s11  ;;  %v93_v43 = vstv %s498_s12  ;;  %s339_s23 = sld [smem:[#allocation2 + $0x1e]]  ;;  %s340_s24 = sld [smem:[#allocation2 + $0x1f]] }
  0x1c   :  { %v55_v26 = vadd.f32 %v54_v22, %v52_v20  ;;  %v62_v27 = vadd.f32 %v61_v23, %v59_v21  ;;  %v98_v44 = vstv %s502_s13  ;;  %v100_v45 = vstv %s504_s14  ;;  %s341_s25 = sld [smem:[#allocation2 + $0x20]]  ;;  %s342_s26 = sld [smem:[#allocation2 + $0x21]] }
  0x1d   :  { %v96_v52 = vstv %s510_s15  ;;  %v103_v53 = vstv %s512_s16  ;;  %s343_s27 = sld [smem:[#allocation2 + $0x22]]  ;;  %s344_s28 = sld [smem:[#allocation2 + $0x23]] }
  0x1e   :  { %v57_v32 = vadd.f32 %v56_v24, %v55_v26  ;;  %v64_v33 = vadd.f32 %v63_v25, %v62_v27  ;;  %v113_v58 = vstv %s516_s17  ;;  %v115_v59 = vstv %s518_s18  ;;  %s347_s29 = sld [smem:[#allocation2 + $0x24]]  ;;  %s349_s30 = sld [smem:[#allocation2 + $0x26]] }
  0x1f   :  { %v120_v60 = vstv %s335_s19  ;;  %v122_v61 = vstv %s336_s20  ;;  %s348_s0 = sld [smem:[#allocation2 + $0x25]]  ;;  %s350_s3 = sld [smem:[#allocation2 + $0x27]] }
  0x20   :  { %v72_v34 = vmul.f32 %v71_v28, %v57_v32  ;;  %v74_v35 = vmul.f32 %v73_v29, %v64_v33  ;;  %v79_v36 = vmul.f32 %v78_v30, %v57_v32  ;;  %v81_v37 = vmul.f32 %v80_v31, %v64_v33  ;;  %s531_s4 = sld [smem:[#allocation2 + $0x28]]  ;;  %s352_s5 = sld [smem:[#allocation2 + $0x29]] }
  0x21   :  { %v118_v4 = vstv %s526_s21  ;;  %v125_v5 = vstv %s338_s22  ;;  %v133_v8 = vstv %s339_s23  ;;  %v135_v9 = vstv %s340_s24  ;;  %s533_s6 = sld [smem:[#allocation2 + $0x2a]]  ;;  %s535_s7 = sld [smem:[#allocation2 + $0x2b]] }
  0x22   :  { %v75_v40 = vadd.f32 %v74_v35, %v72_v34  ;;  %v82_v41 = vadd.f32 %v81_v37, %v79_v36  ;;  %v140_v10 = vstv %s341_s25  ;;  %v142_v11 = vstv %s342_s26  ;;  %s537_s1 = sld [smem:[#allocation2 + $0x2c]]  ;;  %s539_s8 = sld [smem:[#allocation2 + $0x2d]] }
  0x23   :  { %v138_v18 = vstv %s343_s27  ;;  %v145_v19 = vstv %s344_s28  ;;  %s541_s9 = sld [smem:[#allocation2 + $0x2e]]  ;;  %s543_s10 = sld [smem:[#allocation2 + $0x2f]] }
  0x24   :  { %v77_v46 = vadd.f32 %v76_v38, %v75_v40  ;;  %v84_v47 = vadd.f32 %v83_v39, %v82_v41  ;;  %v165_v30 = vstv %s347_s29  ;;  %v172_v31 = vstv %s349_s30  ;;  %s545_s11 = sld [smem:[#allocation2 + $0x30]]  ;;  %s547_s12 = sld [smem:[#allocation2 + $0x31]] }
  0x25   :  { %v167_v32 = vstv %s348_s0  ;;  %v174_v33 = vstv %s350_s3  ;;  %s550_s13 = sld [smem:[#allocation2 + $0x32]]  ;;  %s552_s14 = sld [smem:[#allocation2 + $0x33]] }
  0x26   :  { %v92_v48 = vmul.f32 %v91_v42, %v77_v46  ;;  %v94_v49 = vmul.f32 %v93_v43, %v84_v47  ;;  %v99_v50 = vmul.f32 %v98_v44, %v77_v46  ;;  %v101_v51 = vmul.f32 %v100_v45, %v84_v47  ;;  %s558_s15 = sld [smem:[#allocation2 + $0x34]]  ;;  %s560_s16 = sld [smem:[#allocation2 + $0x35]] }
  0x27   :  { %v170_v40 = vstv %s531_s4  ;;  %v177_v41 = vstv %s352_s5  ;;  %v185_v44 = vstv %s533_s6  ;;  %v187_v45 = vstv %s535_s7  ;;  %s562_s17 = sld [smem:[#allocation2 + $0x36]]  ;;  %s564_s18 = sld [smem:[#allocation2 + $0x37]] }
  0x28   :  { %v95_v54 = vadd.f32 %v94_v49, %v92_v48  ;;  %v102_v55 = vadd.f32 %v101_v51, %v99_v50  ;;  %v192_v46 = vstv %s537_s1  ;;  %v194_v47 = vstv %s539_s8  ;;  %s568_s19 = sld [smem:[#allocation2 + $0x38]]  ;;  %s570_s20 = sld [smem:[#allocation2 + $0x39]] }
  0x29   :  { %s576_s21 = sld [smem:[#allocation2 + $0x3a]]  ;;  %s578_s22 = sld [smem:[#allocation2 + $0x3b]] }
  0x2a   :  { %v97_v56 = vadd.f32 %v96_v52, %v95_v54  ;;  %v104_v57 = vadd.f32 %v103_v53, %v102_v55  ;;  %v190_v54 = vstv %s541_s9  ;;  %v197_v55 = vstv %s543_s10  ;;  %s582_s23 = sld [smem:[#allocation2 + $0x3c]]  ;;  %s584_s24 = sld [smem:[#allocation2 + $0x3d]] }
  0x2b   :  { %s373_s25 = sld [smem:[#allocation2 + $0x3e]]  ;;  %s374_s26 = sld [smem:[#allocation2 + $0x3f]] }
  0x2c   :  { %v105_v62 = vmax.f32 %v97_v56, 0.0  ;;  %v106_v63 = vmax.f32 %v104_v57, 0.0  ;;  %s592_s27 = sld [smem:[#allocation2 + $0x40]]  ;;  %s376_s28 = sld [smem:[#allocation2 + $0x41]] }
  0x2d   :  { %s377_s29 = sld [smem:[#allocation2 + $0x42]]  ;;  %s378_s30 = sld [smem:[#allocation2 + $0x43]] }
  0x2e   :  { %v114_v0 = vmul.f32 %v113_v58, %v105_v62  ;;  %v116_v1 = vmul.f32 %v115_v59, %v106_v63  ;;  %v121_v2 = vmul.f32 %v120_v60, %v105_v62  ;;  %v123_v3 = vmul.f32 %v122_v61, %v106_v63  ;;  %s379_s0 = sld [smem:[#allocation2 + $0x44]]  ;;  %s380_s3 = sld [smem:[#allocation2 + $0x45]] }
  0x2f   :  { %v205_v58 = vstv %s545_s11  ;;  %v207_v59 = vstv %s547_s12  ;;  %v212_v60 = vstv %s550_s13  ;;  %v214_v61 = vstv %s552_s14  ;;  %s381_s4 = sld [smem:[#allocation2 + $0x46]]  ;;  %s382_s5 = sld [smem:[#allocation2 + $0x47]] }
  0x30   :  { %v117_v6 = vadd.f32 %v116_v1, %v114_v0  ;;  %v124_v7 = vadd.f32 %v123_v3, %v121_v2  ;;  %s440_s6 = smov [#allocation5]  }
  0x31   :  { %s301_s7 = sshll.u32 %s440_s6, 4  ;;  %s302_s7 = int_to_ptr.vmem [resolvable:$true] %s301_s7 }
  0x32   :  { %v119_v12 = vadd.f32 %v118_v4, %v117_v6  ;;  %v126_v13 = vadd.f32 %v125_v5, %v124_v7  ;;  %v210_v4 = vstv %s558_s15  ;;  %v217_v5 = vstv %s560_s16  ;;  %s413_s1 = scalar_lea.vmem %s302_s7, 32  ;;  %p418_p4 = scmp.lt.s32.totalorder %s302_s7, %s302_s7 }
  0x33   :  { %p414_p3 = scmp.ne.s32.totalorder %s302_s7, %s413_s1  ;;  %p419_p5 = scmp.lt.s32.totalorder %s413_s1, %s413_s1 }
  0x34   :  { %v134_v14 = vmul.f32 %v133_v8, %v119_v12  ;;  %v136_v15 = vmul.f32 %v135_v9, %v126_v13  ;;  %v141_v16 = vmul.f32 %v140_v10, %v119_v12  ;;  %v143_v17 = vmul.f32 %v142_v11, %v126_v13 }
  0x35   :  { %v225_v8 = vstv %s562_s17  ;;  %v227_v9 = vstv %s564_s18  ;;  %v232_v10 = vstv %s568_s19  ;;  %v234_v11 = vstv %s570_s20  ;;  %p420_p6 = por %p419_p5, %p418_p4 }
  0x36   :  { %v137_v20 = vadd.f32 %v136_v15, %v134_v14  ;;  %v144_v21 = vadd.f32 %v143_v17, %v141_v16 }
  0x37   :  { %p421_p7 = pnand %p420_p6, %p414_p3 }
  0x38   :  { %v139_v22 = vadd.f32 %v138_v18, %v137_v20  ;;  %v146_v23 = vadd.f32 %v145_v19, %v144_v21  ;;  %v230_v18 = vstv %s576_s21  ;;  %v237_v19 = vstv %s578_s22 }
  0x3a   :  { %v345_v24 = vmul.f32 -1.442695, %v139_v22  ;;  %v346_v25 = vmul.f32 -1.442695, %v146_v23 }
  0x3c   :  { %387 = vpow2.f32 %v345_v24  ;;  %v247_v24 = vstv %s582_s23 }
  0x3d   :  { %389 = vpow2.f32 %v346_v25  ;;  %v249_v25 = vstv %s584_s24 }
  0x46   :  { %v388_v26 = vpop.eup %387 }
  0x47   :  { %v390_v27 = vpop.eup %389  ;;  %v150_v28 = vadd.f32 1.0, %v388_v26  ;;  %v254_v26 = vstv %s373_s25 }
  0x48   :  { %v156_v29 = vadd.f32 1.0, %v390_v27  ;;  %v256_v27 = vstv %s374_s26 }
  0x49   :  { %391 = vrcp.f32 %v150_v28 }
  0x4a   :  { %393 = vrcp.f32 %v156_v29 }
  0x53   :  { %v392_v34 = vpop.eup %391 }
  0x54   :  { %v394_v35 = vpop.eup %393  ;;  %v166_v36 = vmul.f32 %v392_v34, %v165_v30  ;;  %v173_v37 = vmul.f32 %v392_v34, %v172_v31  ;;  %v252_v34 = vstv %s592_s27 }
  0x55   :  { %v168_v38 = vmul.f32 %v394_v35, %v167_v32  ;;  %v175_v39 = vmul.f32 %v394_v35, %v174_v33  ;;  %v259_v35 = vstv %s376_s28 }
  0x57   :  { %v169_v42 = vadd.f32 %v168_v38, %v166_v36  ;;  %v176_v43 = vadd.f32 %v175_v39, %v173_v37  ;;  %v267_v38 = vstv %s377_s29  ;;  %v269_v39 = vstv %s378_s30 }
  0x59   :  { %v171_v48 = vadd.f32 %v170_v40, %v169_v42  ;;  %v178_v49 = vadd.f32 %v177_v41, %v176_v43  ;;  %v274_v40 = vstv %s379_s0  ;;  %v276_v41 = vstv %s380_s3 }
  0x5b   :  { %v186_v50 = vmul.f32 %v185_v44, %v171_v48  ;;  %v188_v51 = vmul.f32 %v187_v45, %v178_v49  ;;  %v193_v52 = vmul.f32 %v192_v46, %v171_v48  ;;  %v195_v53 = vmul.f32 %v194_v47, %v178_v49 }
  0x5c   :  { %v272_v48 = vstv %s381_s4  ;;  %v279_v49 = vstv %s382_s5 }
  0x5d   :  { %v189_v56 = vadd.f32 %v188_v51, %v186_v50  ;;  %v196_v57 = vadd.f32 %v195_v53, %v193_v52 }
  0x5f   :  { %v191_v62 = vadd.f32 %v190_v54, %v189_v56  ;;  %v198_v63 = vadd.f32 %v197_v55, %v196_v57 }
  0x61   :  { %v206_v0 = vmul.f32 %v205_v58, %v191_v62  ;;  %v208_v1 = vmul.f32 %v207_v59, %v198_v63  ;;  %v213_v2 = vmul.f32 %v212_v60, %v191_v62  ;;  %v215_v3 = vmul.f32 %v214_v61, %v198_v63 }
  0x63   :  { %v209_v6 = vadd.f32 %v208_v1, %v206_v0  ;;  %v216_v7 = vadd.f32 %v215_v3, %v213_v2 }
  0x65   :  { %v211_v12 = vadd.f32 %v210_v4, %v209_v6  ;;  %v218_v13 = vadd.f32 %v217_v5, %v216_v7 }
  0x67   :  { %v226_v14 = vmul.f32 %v225_v8, %v211_v12  ;;  %v228_v15 = vmul.f32 %v227_v9, %v218_v13  ;;  %v233_v16 = vmul.f32 %v232_v10, %v211_v12  ;;  %v235_v17 = vmul.f32 %v234_v11, %v218_v13 }
  0x69   :  { %v229_v20 = vadd.f32 %v228_v15, %v226_v14  ;;  %v236_v21 = vadd.f32 %v235_v17, %v233_v16 }
  0x6b   :  { %v231_v22 = vadd.f32 %v230_v18, %v229_v20  ;;  %v238_v23 = vadd.f32 %v237_v19, %v236_v21 }
  0x6d   :  { %v239_v28 = vmax.f32 %v231_v22, 0.0  ;;  %v240_v29 = vmax.f32 %v238_v23, 0.0 }
  0x6f   :  { %v248_v30 = vmul.f32 %v247_v24, %v239_v28  ;;  %v250_v31 = vmul.f32 %v249_v25, %v240_v29  ;;  %v255_v32 = vmul.f32 %v254_v26, %v239_v28  ;;  %v257_v33 = vmul.f32 %v256_v27, %v240_v29 }
  0x71   :  { %v251_v36 = vadd.f32 %v250_v31, %v248_v30  ;;  %v258_v37 = vadd.f32 %v257_v33, %v255_v32 }
  0x73   :  { %v253_v42 = vadd.f32 %v252_v34, %v251_v36  ;;  %v260_v43 = vadd.f32 %v259_v35, %v258_v37 }
  0x75   :  { %v268_v44 = vmul.f32 %v267_v38, %v253_v42  ;;  %v270_v45 = vmul.f32 %v269_v39, %v260_v43  ;;  %v275_v46 = vmul.f32 %v274_v40, %v253_v42  ;;  %v277_v47 = vmul.f32 %v276_v41, %v260_v43 }
  0x77   :  { %v271_v50 = vadd.f32 %v270_v45, %v268_v44  ;;  %v278_v51 = vadd.f32 %v277_v47, %v275_v46 }
  0x79   :  { %v273_v52 = vadd.f32 %v272_v48, %v271_v50  ;;  %v280_v53 = vadd.f32 %v279_v49, %v278_v51 }
  0x7b   :  { %v383_v54 = vmul.f32 -1.442695, %v273_v52  ;;  %v384_v55 = vmul.f32 -1.442695, %v280_v53 }
  0x7d   :  { %395 = vpow2.f32 %v383_v54 }
  0x7e   :  { %397 = vpow2.f32 %v384_v55 }
  0x87   :  { %v396_v56 = vpop.eup %395 }
  0x88   :  { %v398_v57 = vpop.eup %397  ;;  %v284_v58 = vadd.f32 1.0, %v396_v56 }
  0x89   :  { %v290_v59 = vadd.f32 1.0, %v398_v57 }
  0x8a   :  { %399 = vrcp.f32 %v284_v58 }
  0x8b   :  { %401 = vrcp.f32 %v290_v59 }
  0x94   :  { %v400_v60 = vpop.eup %399 }
  0x95   :  { %v402_v61 = vpop.eup %401  ;;  %293 = vst [vmem:[#allocation5] sm:$0x1] %v400_v60 }
  0x96   :  { %294 = vst [vmem:[#allocation5 + $0x1] sm:$0x1] %v402_v61 }
  0x97   :  { %424 = shalt.err (!%p421_p7)
}
  0x98   :  { %s425_s10 = scalar_lea.hbm %s611_s2, 32 }
  0x99   :  { %p426_p8 = scmp.ne.s32.totalorder %s611_s2, %s425_s10  ;;  %p429_p9 = scmp.lt.u32.totalorder %s425_s10, %s611_s2 }
  0x9b   :  { %p431_p10 = pnand %p429_p9, %p426_p8 }
  0x9d   :  { %434 = shalt.err (!%p431_p10)
}
  0x9e   :  { %304 = dma.vmem_to_hbm [thread:$0]  %s302_s7, 32, %s611_s2, [#allocation3]  }
  0x9f   :  { %437 = dma.done.wait [#allocation3], 32  }
  0xa0   :  { %438 = vsyncadd [#allocation3], 4294967264 }
  0xa1   :  { %308 = vsyncpa [#allocation3], 1 }
  0xa2   :  { %309 = vsyncpa [#allocation4], 1 }

</bundles_post_ra>
